<compile_context>
chip_gen: v7x
topology: tpu7x:2x2x1
jax: 0.10.0
libtpu: 0.0.40
codegen_flags: <defaults>
</compile_context>

<pallas_src>
import jax
import jax.numpy as jnp
from jax.experimental import pallas as pl
from jax.experimental.pallas import tpu as pltpu

EPSILON = 0.1
_SCALE = 10.0 * 4.0 / (EPSILON * EPSILON)   # = 4000.0
_BIAS = -10.0
_LANE = 128
_ACC_ROWS = 8
_DEFAULT_BLOCK_BYTES = 4 * 1024 * 1024      # ~4 MiB per input per pipeline buffer


def _largest_divisor_leq(n, cap, multiple_of=1):
    """Largest d with d | n, d <= cap, d % multiple_of == 0 (or None)."""
    cap = min(cap, n)
    for d in range(cap, 0, -1):
        if n % d == 0 and d % multiple_of == 0:
            return d
    return None


def _pick_tiles(n, hw, itemsize, block_bytes):
    """Tile channel-0 viewed as (n, r, 128) lane-dense rows."""
    gran = max(8, 32 // itemsize)            # sublane granularity: f32 8, bf16 16, int8 32
    r = pl.cdiv(hw, _LANE)
    row_bytes = _LANE * itemsize
    plane_bytes = r * row_bytes
    if plane_bytes <= block_bytes:
        # Whole per-sample plane fits: tile over N only (tile_r == full R is
        # always a legal sublane extent).
        tile_r = r
        tile_n = _largest_divisor_leq(n, max(1, block_bytes // plane_bytes)) or 1
    else:
        tile_n = 1
        budget_rows = max(gran, (block_bytes // row_bytes) // gran * gran)
        # Prefer an exact divisor (no padding); otherwise pad R up in wrapper.
        tile_r = _largest_divisor_leq(r, budget_rows, multiple_of=gran) or budget_rows
    grid_r = pl.cdiv(r, tile_r)
    return tile_n, tile_r, n // tile_n, grid_r


def _loss_kernel(t_ref, o_ref, out_ref, acc_ref):
    # t_ref / o_ref: (tile_n, tile_r, 128) lane-dense blocks of channel 0.
    ri = pl.program_id(1)

    @pl.when(ri == 0)
    def _init():
        acc_ref[...] = jnp.zeros_like(acc_ref)

    t = t_ref[...].astype(jnp.float32)
    o = o_ref[...].astype(jnp.float32)
    diff = t - o
    se = diff * diff
    # TODO(synk): on v5e, if VALU becomes the binding slot, swap for
    #             e = jnp.exp(-(_SCALE*se + _BIAS)); w = pl.reciprocal(1+e, approx=True).
    w = jax.nn.sigmoid(_SCALE * se + _BIAS)
    part = w * se                                         # (tile_n, tile_r, 128)

    tile_n, tile_r, lanes = part.shape
    if tile_r % _ACC_ROWS == 0:
        # Layout-preserving fold of the leading / sublane-group axes: pure
        # vreg adds into the fixed (8, 128) accumulator.
        acc_ref[...] += part.reshape(
            tile_n * tile_r // _ACC_ROWS, _ACC_ROWS, lanes).sum(axis=0)
    else:
        # Small-plane case (tile_r == full R, not a multiple of 8).
        col = jnp.sum(part, axis=0)                       # (tile_r, 128)
        acc_ref[0:1, :] += jnp.sum(col, axis=0, keepdims=True)

    @pl.when(ri == pl.num_programs(1) - 1)
    def _finalize():
        out_ref[0] = acc_ref[...]                         # per-N-tile partial (8, 128)


def sigmoid_based_mse_loss(target, output, *, block_bytes=_DEFAULT_BLOCK_BYTES):
    """target, output: (N, C, H, W) arrays. Returns scalar float32 loss."""
    assert target.shape == output.shape
    n, c, h, w = target.shape
    hw = h * w
    itemsize = target.dtype.itemsize

    tile_n, tile_r, grid_n, grid_r = _pick_tiles(n, hw, itemsize, block_bytes)
    r_pad = grid_r * tile_r
    needs_copy = (r_pad * _LANE != hw)   # awkward H*W: slice ch0 + zero-pad (rare path)

    def _as_planes(x):
        if not needs_copy:
            return x.reshape(n, c, r_pad, _LANE)          # free metadata reshape
        x0 = x[:, 0].reshape(n, hw)
        x0 = jnp.pad(x0, ((0, 0), (0, r_pad * _LANE - hw)))   # zeros -> se == 0 -> adds 0
        return x0.reshape(n, 1, r_pad, _LANE)

    t4 = _as_planes(target)
    o4 = _as_planes(output)

    # Channel 0 selected via the squeezed C dim: no channel-slice copy when
    # needs_copy is False.
    in_spec = pl.BlockSpec((tile_n, None, tile_r, _LANE),
                           lambda ni, ri: (ni, 0, ri, 0))
    out_spec = pl.BlockSpec((1, _ACC_ROWS, _LANE), lambda ni, ri: (ni, 0, 0))

    elems = n * hw
    cost = pl.CostEstimate(
        flops=7 * elems,
        transcendentals=elems,
        bytes_accessed=2 * elems * itemsize + grid_n * _ACC_ROWS * _LANE * 4)

    partials = pl.pallas_call(
        _loss_kernel,
        out_shape=jax.ShapeDtypeStruct((grid_n, _ACC_ROWS, _LANE), jnp.float32),
        grid=(grid_n, grid_r),
        in_specs=[in_spec, in_spec],
        out_specs=out_spec,
        scratch_shapes=[pltpu.VMEM((_ACC_ROWS, _LANE), jnp.float32)],
        compiler_params=pltpu.CompilerParams(
            dimension_semantics=("parallel", "arbitrary"),
            vmem_limit_bytes=32 * 1024 * 1024),
        cost_estimate=cost,
    )(t4, o4)

    return jnp.sum(partials) * (1.0 / float(n * hw))


def _reference(target, output):
    se = (target[:, 0].astype(jnp.float32) - output[:, 0].astype(jnp.float32)) ** 2
    eps2 = EPSILON ** 2
    b = 10.0
    return jnp.mean(jax.nn.sigmoid(b * (4.0 * se / eps2 - 1.0)) * se)


if __name__ == "__main__":
    key = jax.random.PRNGKey(0)
    keys = jax.random.split(key, 6)

    # 1) Small NCHW shape (H*W = 256, multiple of 128): single-block path.
    target = jax.random.normal(keys[0], (2, 4, 16, 16), dtype=jnp.float32)
    output = jax.random.normal(keys[1], (2, 4, 16, 16), dtype=jnp.float32)
    loss = sigmoid_based_mse_loss(target, output)
    jax.block_until_ready(loss)
    ref = _reference(target, output)
    assert jnp.allclose(loss, ref, rtol=1e-5, atol=1e-6), (loss, ref)

    # 2) Force small blocks: exercises per-N-tile partials ("parallel" axis,
    #    grid_n=2) and streaming accumulation over the R axis (grid_r=4).
    t2 = jax.random.normal(keys[2], (2, 3, 64, 64), dtype=jnp.float32)
    o2 = jax.random.normal(keys[3], (2, 3, 64, 64), dtype=jnp.float32)
    loss2 = sigmoid_based_mse_loss(t2, o2, block_bytes=4096)
    jax.block_until_ready(loss2)
    ref2 = _reference(t2, o2)
    assert jnp.allclose(loss2, ref2, rtol=1e-5, atol=1e-6), (loss2, ref2)

    # 3) H*W not a multiple of 128 (28*28=784): zero-pad fallback path.
    t3 = jax.random.normal(keys[4], (2, 3, 28, 28), dtype=jnp.float32)
    o3 = jax.random.normal(keys[5], (2, 3, 28, 28), dtype=jnp.float32)
    loss3 = sigmoid_based_mse_loss(t3, o3)
    jax.block_until_ready(loss3)
    ref3 = _reference(t3, o3)
    assert jnp.allclose(loss3, ref3, rtol=1e-5, atol=1e-6), (loss3, ref3)

    print("KERNEL_OK")
</pallas_src>

<mosaic_0001>
module attributes {stable_mosaic.version = 11 : i64} {
  func.func @_loss_kernel(%arg0: i32, %arg1: i32, %arg2: memref<2x1x2x128xf32, #tpu.memory_space<vmem>>, %arg3: memref<2x1x2x128xf32, #tpu.memory_space<vmem>>, %arg4: memref<1x8x128xf32, #tpu.memory_space<vmem>>, %arg5: memref<8x128xf32, #tpu.memory_space<vmem>>) attributes {dimension_semantics = [#tpu.dimension_semantics<parallel>, #tpu.dimension_semantics<arbitrary>], iteration_bounds = array<i64: 1, 1>, scalar_prefetch = 0 : i64, scratch_operands = 1 : i64, tpu.core_type = #tpu.core_type<tc>, window_params = [{transform_indices = @transform_0, window_bounds = array<i64: 2, 1, 2, 128>}, {transform_indices = @transform_1, window_bounds = array<i64: 2, 1, 2, 128>}, {transform_indices = @transform_2, window_bounds = array<i64: 1, 8, 128>}]} {
    %c0_i32 = arith.constant 0 : i32
    %0 = arith.cmpi eq, %arg1, %c0_i32 : i32
    %1 = arith.extui %0 : i1 to i32
    %c0_i32_0 = arith.constant 0 : i32
    %2 = arith.cmpi ne, %1, %c0_i32_0 : i32
    scf.if %2 {
      %cst_18 = arith.constant 0.000000e+00 : f32
      %28 = vector.broadcast %cst_18 : f32 to vector<8x128xf32>
      %c0_19 = arith.constant 0 : index
      %c0_20 = arith.constant 0 : index
      %29 = vector.load %arg5[%c0_19, %c0_20] : memref<8x128xf32, #tpu.memory_space<vmem>>, vector<8x128xf32>
      tpu.vector_store %arg5[%c0_19, %c0_20], %28 {strides = array<i32>} : memref<8x128xf32, #tpu.memory_space<vmem>>, vector<8x128xf32>,
    } else {
    }
    %c0 = arith.constant 0 : index
    %c0_1 = arith.constant 0 : index
    %c0_2 = arith.constant 0 : index
    %c0_3 = arith.constant 0 : index
    %3 = vector.load %arg2[%c0, %c0_1, %c0_2, %c0_3] : memref<2x1x2x128xf32, #tpu.memory_space<vmem>>, vector<2x1x2x128xf32>
    %4 = vector.shape_cast %3 : vector<2x1x2x128xf32> to vector<2x2x128xf32>
    %c0_4 = arith.constant 0 : index
    %c0_5 = arith.constant 0 : index
    %c0_6 = arith.constant 0 : index
    %c0_7 = arith.constant 0 : index
    %5 = vector.load %arg3[%c0_4, %c0_5, %c0_6, %c0_7] : memref<2x1x2x128xf32, #tpu.memory_space<vmem>>, vector<2x1x2x128xf32>
    %6 = vector.shape_cast %5 : vector<2x1x2x128xf32> to vector<2x2x128xf32>
    %7 = arith.subf %4, %6 : vector<2x2x128xf32>
    %8 = arith.mulf %7, %7 : vector<2x2x128xf32>
    %cst = arith.constant 4.000000e+03 : f32
    %9 = vector.broadcast %cst : f32 to vector<2x2x128xf32>
    %10 = arith.mulf %9, %8 : vector<2x2x128xf32>
    %cst_8 = arith.constant -1.000000e+01 : f32
    %11 = vector.broadcast %cst_8 : f32 to vector<2x2x128xf32>
    %12 = arith.addf %10, %11 : vector<2x2x128xf32>
    %13 = arith.negf %12 : vector<2x2x128xf32>
    %14 = math.exp %13 : vector<2x2x128xf32>
    %cst_9 = arith.constant 1.000000e+00 : f32
    %15 = vector.broadcast %cst_9 : f32 to vector<2x2x128xf32>
    %16 = arith.addf %15, %14 : vector<2x2x128xf32>
    %17 = arith.divf %15, %16 : vector<2x2x128xf32>
    %18 = arith.mulf %17, %8 : vector<2x2x128xf32>
    %cst_10 = arith.constant dense<0.000000e+00> : vector<2x128xf32>
    %19 = vector.multi_reduction <add>, %18, %cst_10 [0] : vector<2x2x128xf32> to vector<2x128xf32>
    %c0_11 = arith.constant 0 : index
    %c0_12 = arith.constant 0 : index
    %20 = vector.load %arg5[%c0_11, %c0_12] : memref<8x128xf32, #tpu.memory_space<vmem>>, vector<1x128xf32>
    %cst_13 = arith.constant dense<0.000000e+00> : vector<128xf32>
    %21 = vector.multi_reduction <add>, %19, %cst_13 [0] : vector<2x128xf32> to vector<128xf32>
    %22 = vector.shape_cast %21 : vector<128xf32> to vector<1x128xf32>
    %23 = arith.addf %20, %22 : vector<1x128xf32>
    %c0_14 = arith.constant 0 : index
    %c0_15 = arith.constant 0 : index
    %24 = vector.load %arg5[%c0_14, %c0_15] : memref<8x128xf32, #tpu.memory_space<vmem>>, vector<1x128xf32>
    tpu.vector_store %arg5[%c0_14, %c0_15], %23 {strides = array<i32>} : memref<8x128xf32, #tpu.memory_space<vmem>>, vector<1x128xf32>,
    %c0_i32_16 = arith.constant 0 : i32
    %25 = arith.cmpi eq, %arg1, %c0_i32_16 : i32
    %26 = arith.extui %25 : i1 to i32
    %c0_i32_17 = arith.constant 0 : i32
    %27 = arith.cmpi ne, %26, %c0_i32_17 : i32
    scf.if %27 {
      %c0_18 = arith.constant 0 : index
      %c0_19 = arith.constant 0 : index
      %28 = vector.load %arg5[%c0_18, %c0_19] : memref<8x128xf32, #tpu.memory_space<vmem>>, vector<8x128xf32>
      %c0_20 = arith.constant 0 : index
      %c0_21 = arith.constant 0 : index
      %c0_22 = arith.constant 0 : index
      %29 = vector.load %arg4[%c0_20, %c0_21, %c0_22] : memref<1x8x128xf32, #tpu.memory_space<vmem>>, vector<1x8x128xf32>
      %30 = vector.shape_cast %29 : vector<1x8x128xf32> to vector<8x128xf32>
      %31 = vector.shape_cast %28 : vector<8x128xf32> to vector<1x8x128xf32>
      tpu.vector_store %arg4[%c0_20, %c0_21, %c0_22], %31 {strides = array<i32>} : memref<1x8x128xf32, #tpu.memory_space<vmem>>, vector<1x8x128xf32>,
    } else {
    }
    return
  }
  func.func @transform_0(%arg0: i32, %arg1: i32) -> (i32, i32, i32, i32) {
    %c0_i32 = arith.constant 0 : i32
    %c0_i32_0 = arith.constant 0 : i32
    %c0_i32_1 = arith.constant 0 : i32
    return %arg0, %c0_i32, %arg1, %c0_i32_0 : i32, i32, i32, i32
  }
  func.func @transform_1(%arg0: i32, %arg1: i32) -> (i32, i32, i32, i32) {
    %c0_i32 = arith.constant 0 : i32
    %c0_i32_0 = arith.constant 0 : i32
    %c0_i32_1 = arith.constant 0 : i32
    return %arg0, %c0_i32, %arg1, %c0_i32_0 : i32, i32, i32, i32
  }
  func.func @transform_2(%arg0: i32, %arg1: i32) -> (i32, i32, i32) {
    %c0_i32 = arith.constant 0 : i32
    %c0_i32_0 = arith.constant 0 : i32
    %c0_i32_1 = arith.constant 0 : i32
    return %arg0, %c0_i32, %c0_i32_0 : i32, i32, i32
  }
}

</mosaic_0001>

<bundles_post_ra>
// kernel: tpu_custom_call.1
= control target key start
LH: loop header
LB: loop body
LE: loop exit
PB: predicated region body
PF: predicated region fallthrough
CT: control target
= control target key end

     0   :  { %7 = vsyncpa [#allocation4], 0  ;;  %s259_s0 = inlined_call_operand.hbm [shape: f32[2,4,2,128], index: 0, kind: input, shape index: {}]   ;;  %s260_s1 = inlined_call_operand.hbm [shape: f32[2,4,2,128], index: 1, kind: input, shape index: {}]   ;;  %s261_s2 = inlined_call_operand.hbm [shape: f32[1,8,128], index: 2, kind: output, shape index: {}]  }
   0x1   :  { %8 = vsyncpa [#allocation7], 0 }
   0x2   :  { %9 = vsyncpa [#allocation5], 0  ;;  %s195_s9 = smov [#allocation3]   ;;  %s123_s13 = scalar_lea.hbm %s259_s0, 64 }
   0x3   :  { %s15_s10 = sshll.u32 %s195_s9, 4  ;;  %p124_p0 = scmp.ne.s32.totalorder %s259_s0, %s123_s13  ;;  %s16_s10 = int_to_ptr.vmem [resolvable:$true] %s15_s10 }
   0x4   :  { %s125_s18 = scalar_lea.hbm %s259_s0, 256  ;;  %p127_p2 = scmp.lt.u32.totalorder %s123_s13, %s259_s0 }
   0x5   :  { %p126_p1 = scmp.lt.u32.totalorder %s125_s18, %s123_s13 }
   0x7   :  { %p128_p3 = por %p127_p2, %p126_p1 }
   0x9   :  { %p129_p4 = pnand %p128_p3, %p124_p0 }
   0xb   :  { %132 = shalt.err (!%p129_p4)
}
   0xc   :  { %s133_s21 = scalar_lea.vmem %s16_s10, 64  ;;  %p138_p6 = scmp.lt.s32.totalorder %s16_s10, %s16_s10 }
   0xd   :  { %p134_p5 = scmp.ne.s32.totalorder %s16_s10, %s133_s21  ;;  %p139_p7 = scmp.lt.s32.totalorder %s133_s21, %s133_s21 }
   0xf   :  { %p140_p8 = por %p139_p7, %p138_p6 }
  0x11   :  { %p141_p9 = pnand %p140_p8, %p134_p5 }
  0x13   :  { %144 = shalt.err (!%p141_p9)
}
  0x14   :  { %s196_s22 = smov 128   ;;  %s197_s23 = smov 32  }
  0x15   :  { %s198_s24 = smov 2   ;;  %s199_s27 = smov [#allocation6]  }
  0x16   :  { %21 = dma.hbm_to_vmem [thread:$0]  %s259_s0, 64, %s16_s10, [#allocation4], %s196_s22, %s197_s23, %s198_s24  }
  0x17   :  { %s27_s28 = sshll.u32 %s199_s27, 4  ;;  %s145_s3 = scalar_lea.hbm %s260_s1, 64  ;;  %s28_s28 = int_to_ptr.vmem [resolvable:$true] %s27_s28 }
  0x18   :  { %p146_p10 = scmp.ne.s32.totalorder %s260_s1, %s145_s3  ;;  %s147_s8 = scalar_lea.hbm %s260_s1, 256 }
  0x19   :  { %p148_p11 = scmp.lt.u32.totalorder %s147_s8, %s145_s3  ;;  %p149_p12 = scmp.lt.u32.totalorder %s145_s3, %s260_s1 }
  0x1b   :  { %p150_p13 = por %p149_p12, %p148_p11 }
  0x1d   :  { %p151_p0 = pnand %p150_p13, %p146_p10 }
  0x1f   :  { %154 = shalt.err (!%p151_p0)
}
  0x20   :  { %s155_s0 = scalar_lea.vmem %s28_s28, 64  ;;  %p160_p2 = scmp.lt.s32.totalorder %s28_s28, %s28_s28 }
  0x21   :  { %p156_p1 = scmp.ne.s32.totalorder %s28_s28, %s155_s0  ;;  %p161_p3 = scmp.lt.s32.totalorder %s155_s0, %s155_s0 }
  0x23   :  { %p162_p4 = por %p161_p3, %p160_p2 }
  0x25   :  { %p163_p5 = pnand %p162_p4, %p156_p1 }
  0x27   :  { %166 = shalt.err (!%p163_p5)
}
  0x28   :  { %33 = dma.hbm_to_vmem [thread:$0]  %s260_s1, 64, %s28_s28, [#allocation7], %s196_s22, %s197_s23, %s198_s24  }
  0x29   :  { %189 = dma.done.wait [#allocation4], 64  }
  0x2a   :  { %190 = vsyncadd [#allocation4], 4294967232 }
  0x2b   :  { %191 = dma.done.wait [#allocation7], 64  }
  0x2c   :  { %192 = vsyncadd [#allocation7], 4294967232  ;;  %v200_v0 = vmov 0.0   ;;  %v45_v1 = vld [vmem:[#allocation3] sm:$0x3]  ;;  %vm71_vm0 = vcmask 1041408  }
  0x2d   :  { %44 = vst [vmem:[#allocation2] sm:$0xff] %v200_v0  ;;  %v46_v2 = vld [vmem:[#allocation3 + $0x2] sm:$0x3]  ;;  %v47_v3 = vld [vmem:[#allocation6] sm:$0x3]  ;;  %s201_s1 = smov [#allocation8]  }
  0x2e   :  { %v48_v4 = vld [vmem:[#allocation6 + $0x2] sm:$0x3]  ;;  %v49_v5 = vsub.f32 %v45_v1, %v47_v3  ;;  %s96_s13 = sshll.u32 %s201_s1, 4  ;;  %s97_s13 = int_to_ptr.vmem [resolvable:$true] %s96_s13 }
  0x2f   :  { %v50_v6 = vsub.f32 %v46_v2, %v48_v4  ;;  %s167_s14 = scalar_lea.vmem %s97_s13, 128  ;;  %p172_p7 = scmp.lt.s32.totalorder %s97_s13, %s97_s13 }
  0x30   :  { %v51_v7 = vmul.f32 %v49_v5, %v49_v5  ;;  %p168_p6 = scmp.ne.s32.totalorder %s97_s13, %s167_s14  ;;  %p173_p8 = scmp.lt.s32.totalorder %s167_s14, %s167_s14 }
  0x31   :  { %v52_v8 = vmul.f32 %v50_v6, %v50_v6 }
  0x32   :  { %v53_v9 = vmul.f32 4000.0, %v51_v7  ;;  %p174_p9 = por %p173_p8, %p172_p7 }
  0x33   :  { %v54_v10 = vmul.f32 4000.0, %v52_v8 }
  0x34   :  { %v55_v11 = vadd.f32 -10.0, %v53_v9  ;;  %v75_v32 = vld [vmem:[#allocation2] sm:$0x1]  ;;  %p175_p10 = pnand %p174_p9, %p168_p6 }
  0x35   :  { %v56_v12 = vadd.f32 -10.0, %v54_v10 }
  0x36   :  { %v106_v13 = vmul.f32 -1.442695, %v55_v11 }
  0x37   :  { %v107_v14 = vmul.f32 -1.442695, %v56_v12 }
  0x38   :  { %115 = vpow2.f32 %v106_v13 }
  0x39   :  { %117 = vpow2.f32 %v107_v14 }
  0x42   :  { %v116_v15 = vpop.eup %115 }
  0x43   :  { %v118_v16 = vpop.eup %117  ;;  %v63_v17 = vadd.f32 1.0, %v116_v15 }
  0x44   :  { %v64_v18 = vadd.f32 1.0, %v118_v16 }
  0x45   :  { %119 = vrcp.f32 %v63_v17 }
  0x46   :  { %121 = vrcp.f32 %v64_v18 }
  0x4f   :  { %v120_v19 = vpop.eup %119 }
  0x50   :  { %v122_v20 = vpop.eup %121  ;;  %v69_v21 = vmul.f32 %v120_v19, %v51_v7 }
  0x51   :  { %v70_v22 = vmul.f32 %v122_v20, %v52_v8 }
  0x52   :  { %v72_v23 = vsel %vm71_vm0, %v69_v21, 0.0 }
  0x53   :  { %v73_v24 = vsel %vm71_vm0, %v70_v22, 0.0 }
  0x54   :  { %v74_v25 = vadd.f32 %v73_v24, %v72_v23 }
  0x56   :  { %v76_v26 = vsel %vm71_vm0, %v74_v25, 0.0 }
  0x57   :  { %v77_v27 = vrot.slane %v76_v26, 4 }
  0x59   :  { %v78_v28 = vadd.f32 %v77_v27, %v76_v26 }
  0x5b   :  { %v79_v29 = vrot.slane %v78_v28, 2 }
  0x5d   :  { %v80_v30 = vadd.f32 %v79_v29, %v78_v28 }
  0x5f   :  { %v81_v31 = vrot.slane %v80_v30, 1 }
  0x61   :  { %v82_v33 = vadd.f32 %v81_v31, %v80_v30 }
  0x63   :  { %v83_v34 = vadd.f32 %v82_v33, %v75_v32 }
  0x65   :  { %84 = vst [vmem:[#allocation2] sm:$0x1] %v83_v34 }
  0x6c   :  { %v88_v35 = vld [vmem:[#allocation2] sm:$0xff] }
  0x6d   :  { %89 = vst [vmem:[#allocation8] sm:$0xff] %v88_v35 }
  0x6e   :  { %178 = shalt.err (!%p175_p10)
}
  0x6f   :  { %s179_s17 = scalar_lea.hbm %s261_s2, 128 }
  0x70   :  { %p180_p11 = scmp.ne.s32.totalorder %s261_s2, %s179_s17  ;;  %p183_p12 = scmp.lt.u32.totalorder %s179_s17, %s261_s2 }
  0x72   :  { %p185_p13 = pnand %p183_p12, %p180_p11 }
  0x74   :  { %188 = shalt.err (!%p185_p13)
}
  0x75   :  { %99 = dma.vmem_to_hbm [thread:$0]  %s97_s13, 128, %s261_s2, [#allocation5]  }
  0x76   :  { %193 = dma.done.wait [#allocation5], 128  }
  0x77   :  { %194 = vsyncadd [#allocation5], 4294967168 }
  0x78   :  { %103 = vsyncpa [#allocation4], 1 }
  0x79   :  { %104 = vsyncpa [#allocation7], 1 }
  0x7a   :  { %105 = vsyncpa [#allocation5], 1 }

</bundles_post_ra>
